<compile_context>
chip_gen: v6e
topology: v6e:2x2x1
jax: 0.10.0
libtpu: 0.0.40
codegen_flags: <defaults>
</compile_context>

<pallas_src>
import functools

import jax
import jax.numpy as jnp
from jax.experimental import pallas as pl
from jax.experimental.pallas import tpu as pltpu


def _round_up(a, b):
    return (a + b - 1) // b * b


def _pool_mlp_kernel(x_ref, w1t_ref, b1_ref, w2t_ref, b2_ref, y_ref, acc_ref,
                     *, inv_hw):
    j = pl.program_id(1)

    xt = x_ref[...].astype(jnp.float32)            # (1, C, T)

    @pl.when(j == 0)
    def _():
        acc_ref[...] = xt

    @pl.when(j > 0)
    def _():
        acc_ref[...] += xt

    @pl.when(j == pl.num_programs(1) - 1)
    def _():
        # Single cross-lane reduce (XLU) after the VPU partial accumulation.
        pooled = jnp.sum(acc_ref[...], axis=-1) * inv_hw              # (1, C)
        # Tiny squeeze-excite MLP; degenerate shapes, not worth MXU tuning.
        h = jnp.dot(pooled, w1t_ref[...],
                    preferred_element_type=jnp.float32) + b1_ref[...]  # (1, mid)
        h = jnp.maximum(h, 0.0)
        yv = jnp.dot(h, w2t_ref[...],
                     preferred_element_type=jnp.float32) + b2_ref[...]  # (1, C)
        yv = jax.nn.sigmoid(yv)
        y_ref[...] = yv[:, :, None]                                    # (1, C, 1)


def _scale_kernel(x_ref, y_ref, o_ref):
    # x: (1, C, T) native dtype; y: (1, C, 1) f32 -> broadcast over lanes.
    o_ref[...] = x_ref[...] * y_ref[...].astype(o_ref.dtype)


def channel_attention(x, w1, b1, w2, b2, *,
                      max_block_bytes=4 * 1024 * 1024,
                      vmem_limit_bytes=48 * 1024 * 1024):
    """RCAN ChannelAttention forward.

    x : (N, C, H, W), any float dtype (kept native for the big data stream)
    w1: (mid, C), b1: (mid,)   -- Conv2d(C, mid, 1)
    w2: (C, mid), b2: (C,)     -- Conv2d(mid, C, 1)
    """
    N, C, H, W = x.shape
    mid = w1.shape[0]
    hw = H * W
    itemsize = jnp.dtype(x.dtype).itemsize

    # Lane-aligned spatial tile (multiple of 128), capped so one (1, C, T)
    # block stays under ~max_block_bytes -> comfortable on v7x's 64 MiB VMEM.
    lane_cap = max(128, (max_block_bytes // max(1, C * itemsize)) // 128 * 128)
    hw_tile = min(lane_cap, _round_up(hw, 128))
    hw_pad = _round_up(hw, hw_tile)
    n_hw = hw_pad // hw_tile

    x3 = x.reshape(N, C, hw)
    if hw_pad != hw:
        # TODO(synk): mask the spatial remainder in-kernel instead of padding
        # to avoid the extra copy for non-128-aligned H*W.
        x3 = jnp.pad(x3, ((0, 0), (0, 0), (0, hw_pad - hw)))

    # Tiny MLP params in f32, pre-transposed for plain (1,C)@(C,mid) matmuls.
    w1t = jnp.asarray(w1, jnp.float32).T            # (C, mid)
    w2t = jnp.asarray(w2, jnp.float32).T            # (mid, C)
    b1r = jnp.asarray(b1, jnp.float32).reshape(1, mid)
    b2r = jnp.asarray(b2, jnp.float32).reshape(1, C)

    const = lambda i, j: (0, 0)   # weights stay resident across grid steps

    # ---- Pass 1: pooled mean + MLP -> attention vector y (N, C, 1) f32 ----
    pool_cost = pl.CostEstimate(
        flops=N * C * hw_pad + 4 * N * C * mid,
        transcendentals=N * C,
        bytes_accessed=N * C * hw_pad * itemsize + N * C * 4,
    )
    y = pl.pallas_call(
        functools.partial(_pool_mlp_kernel, inv_hw=1.0 / float(hw)),
        out_shape=jax.ShapeDtypeStruct((N, C, 1), jnp.float32),
        grid=(N, n_hw),
        in_specs=[
            pl.BlockSpec((1, C, hw_tile), lambda i, j: (i, 0, j)),
            pl.BlockSpec((C, mid), const),
            pl.BlockSpec((1, mid), const),
            pl.BlockSpec((mid, C), const),
            pl.BlockSpec((1, C), const),
        ],
        out_specs=pl.BlockSpec((1, C, 1), lambda i, j: (i, 0, 0)),
        scratch_shapes=[pltpu.VMEM((1, C, hw_tile), jnp.float32)],
        compiler_params=pltpu.CompilerParams(
            dimension_semantics=("parallel", "arbitrary"),
            vmem_limit_bytes=vmem_limit_bytes),
        cost_estimate=pool_cost,
    )(x3, w1t, b1r, w2t, b2r)

    # ---- Pass 2: elementwise x * y (lane-dense tiles, native dtype) ----
    scale_cost = pl.CostEstimate(
        flops=N * C * hw_pad,
        transcendentals=0,
        bytes_accessed=2 * N * C * hw_pad * itemsize + N * C * 4,
    )
    out = pl.pallas_call(
        _scale_kernel,
        out_shape=jax.ShapeDtypeStruct((N, C, hw_pad), x.dtype),
        grid=(N, n_hw),
        in_specs=[
            pl.BlockSpec((1, C, hw_tile), lambda i, j: (i, 0, j)),
            pl.BlockSpec((1, C, 1), lambda i, j: (i, 0, 0)),
        ],
        out_specs=pl.BlockSpec((1, C, hw_tile), lambda i, j: (i, 0, j)),
        compiler_params=pltpu.CompilerParams(
            dimension_semantics=("parallel", "parallel"),
            vmem_limit_bytes=vmem_limit_bytes),
        cost_estimate=scale_cost,
    )(x3, y)

    if hw_pad != hw:
        out = out[:, :, :hw]
    return out.reshape(N, C, H, W)


def channel_attention_ref(x, w1, b1, w2, b2):
    # Pure-JAX reference mirroring the PyTorch forward.
    xf = x.astype(jnp.float32)
    pooled = jnp.mean(xf, axis=(2, 3))                          # (N, C)
    h = jnp.maximum(pooled @ jnp.asarray(w1, jnp.float32).T + b1, 0.0)
    yv = jax.nn.sigmoid(h @ jnp.asarray(w2, jnp.float32).T + b2)
    return (x * yv[:, :, None, None].astype(x.dtype))


if __name__ == "__main__":
    # Small shapes consistent with the module: num_feat=32, reduction=4 -> mid=8
    N, C, H, W = 2, 32, 16, 16
    reduction = 4
    mid = C // reduction

    key = jax.random.PRNGKey(0)
    kx, k1, k2, k3, k4 = jax.random.split(key, 5)

    x = jax.random.normal(kx, (N, C, H, W), dtype=jnp.float32)

    # Deterministic synthetic parameters (shapes follow nn.Conv2d(C, mid, 1) etc.)
    w1 = jax.random.normal(k1, (mid, C), dtype=jnp.float32) * 0.1
    b1 = jax.random.normal(k2, (mid,), dtype=jnp.float32) * 0.1
    w2 = jax.random.normal(k3, (C, mid), dtype=jnp.float32) * 0.1
    b2 = jax.random.normal(k4, (C,), dtype=jnp.float32) * 0.1

    out = channel_attention(x, w1, b1, w2, b2)
    out = jax.block_until_ready(out)

    ref = channel_attention_ref(x, w1, b1, w2, b2)
    assert out.shape == (N, C, H, W)
    assert out.dtype == x.dtype
    assert jnp.allclose(out, ref, atol=1e-5, rtol=1e-5), "mismatch vs reference"

    print("KERNEL_OK")
</pallas_src>

<mosaic_0001>
module attributes {stable_mosaic.version = 11 : i64} {
  func.func @_pool_mlp_kernel(%arg0: i32, %arg1: i32, %arg2: memref<1x32x256xf32, #tpu.memory_space<vmem>>, %arg3: memref<32x8xf32, #tpu.memory_space<vmem>>, %arg4: memref<1x8xf32, #tpu.memory_space<vmem>>, %arg5: memref<8x32xf32, #tpu.memory_space<vmem>>, %arg6: memref<1x32xf32, #tpu.memory_space<vmem>>, %arg7: memref<1x32x1xf32, #tpu.memory_space<vmem>>, %arg8: memref<1x32x256xf32, #tpu.memory_space<vmem>>) attributes {dimension_semantics = [#tpu.dimension_semantics<parallel>, #tpu.dimension_semantics<arbitrary>], iteration_bounds = array<i64: 2, 1>, scalar_prefetch = 0 : i64, scratch_operands = 1 : i64, tpu.core_type = #tpu.core_type<tc>, window_params = [{transform_indices = @transform_0, window_bounds = array<i64: 1, 32, 256>}, {pipeline_mode = #tpu.pipeline_mode<synchronous>, transform_indices = @transform_1, window_bounds = array<i64: 32, 8>}, {pipeline_mode = #tpu.pipeline_mode<synchronous>, transform_indices = @transform_2, window_bounds = array<i64: 1, 8>}, {pipeline_mode = #tpu.pipeline_mode<synchronous>, transform_indices = @transform_3, window_bounds = array<i64: 8, 32>}, {pipeline_mode = #tpu.pipeline_mode<synchronous>, transform_indices = @transform_4, window_bounds = array<i64: 1, 32>}, {transform_indices = @transform_5, window_bounds = array<i64: 1, 32, 1>}]} {
    %c0 = arith.constant 0 : index
    %c0_0 = arith.constant 0 : index
    %c0_1 = arith.constant 0 : index
    %0 = vector.load %arg2[%c0, %c0_0, %c0_1] : memref<1x32x256xf32, #tpu.memory_space<vmem>>, vector<1x32x256xf32>
    %c0_i32 = arith.constant 0 : i32
    %1 = arith.cmpi eq, %arg1, %c0_i32 : i32
    %2 = arith.extui %1 : i1 to i32
    %c0_i32_2 = arith.constant 0 : i32
    %3 = arith.cmpi ne, %2, %c0_i32_2 : i32
    scf.if %3 {
      %c0_7 = arith.constant 0 : index
      %c0_8 = arith.constant 0 : index
      %c0_9 = arith.constant 0 : index
      %10 = vector.load %arg8[%c0_7, %c0_8, %c0_9] : memref<1x32x256xf32, #tpu.memory_space<vmem>>, vector<1x32x256xf32>
      tpu.vector_store %arg8[%c0_7, %c0_8, %c0_9], %0 {strides = array<i32>} : memref<1x32x256xf32, #tpu.memory_space<vmem>>, vector<1x32x256xf32>,
    } else {
    }
    %c0_i32_3 = arith.constant 0 : i32
    %4 = arith.cmpi sgt, %arg1, %c0_i32_3 : i32
    %5 = arith.extui %4 : i1 to i32
    %c0_i32_4 = arith.constant 0 : i32
    %6 = arith.cmpi ne, %5, %c0_i32_4 : i32
    scf.if %6 {
      %c0_7 = arith.constant 0 : index
      %c0_8 = arith.constant 0 : index
      %c0_9 = arith.constant 0 : index
      %10 = vector.load %arg8[%c0_7, %c0_8, %c0_9] : memref<1x32x256xf32, #tpu.memory_space<vmem>>, vector<1x32x256xf32>
      %11 = arith.addf %10, %0 : vector<1x32x256xf32>
      %c0_10 = arith.constant 0 : index
      %c0_11 = arith.constant 0 : index
      %c0_12 = arith.constant 0 : index
      %12 = vector.load %arg8[%c0_10, %c0_11, %c0_12] : memref<1x32x256xf32, #tpu.memory_space<vmem>>, vector<1x32x256xf32>
      tpu.vector_store %arg8[%c0_10, %c0_11, %c0_12], %11 {strides = array<i32>} : memref<1x32x256xf32, #tpu.memory_space<vmem>>, vector<1x32x256xf32>,
    } else {
    }
    %c0_i32_5 = arith.constant 0 : i32
    %7 = arith.cmpi eq, %arg1, %c0_i32_5 : i32
    %8 = arith.extui %7 : i1 to i32
    %c0_i32_6 = arith.constant 0 : i32
    %9 = arith.cmpi ne, %8, %c0_i32_6 : i32
    scf.if %9 {
      %c0_7 = arith.constant 0 : index
      %c0_8 = arith.constant 0 : index
      %c0_9 = arith.constant 0 : index
      %10 = vector.load %arg8[%c0_7, %c0_8, %c0_9] : memref<1x32x256xf32, #tpu.memory_space<vmem>>, vector<1x32x256xf32>
      %cst = arith.constant dense<0.000000e+00> : vector<1x32xf32>
      %11 = vector.multi_reduction <add>, %10, %cst [2] : vector<1x32x256xf32> to vector<1x32xf32>
      %cst_10 = arith.constant 3.906250e-03 : f32
      %12 = vector.broadcast %cst_10 : f32 to vector<1x32xf32>
      %13 = arith.mulf %11, %12 : vector<1x32xf32>
      %c0_11 = arith.constant 0 : index
      %c0_12 = arith.constant 0 : index
      %14 = vector.load %arg3[%c0_11, %c0_12] : memref<32x8xf32, #tpu.memory_space<vmem>>, vector<32x8xf32>
      %cst_13 = arith.constant dense<0.000000e+00> : vector<1x8xf32>
      %15 = tpu.matmul %13, %14, %cst_13 {dimension_numbers = #tpu.dot_dimension_numbers<[1], [0], [0], [1], [0, 0, 1, 1], [], []>} : vector<1x32xf32>, vector<32x8xf32>, vector<1x8xf32> -> vector<1x8xf32>
      %c0_14 = arith.constant 0 : index
      %c0_15 = arith.constant 0 : index
      %16 = vector.load %arg4[%c0_14, %c0_15] : memref<1x8xf32, #tpu.memory_space<vmem>>, vector<1x8xf32>
      %17 = arith.addf %15, %16 : vector<1x8xf32>
      %cst_16 = arith.constant 0.000000e+00 : f32
      %18 = vector.broadcast %cst_16 : f32 to vector<1x8xf32>
      %19 = arith.maximumf %17, %18 : vector<1x8xf32>
      %c0_17 = arith.constant 0 : index
      %c0_18 = arith.constant 0 : index
      %20 = vector.load %arg5[%c0_17, %c0_18] : memref<8x32xf32, #tpu.memory_space<vmem>>, vector<8x32xf32>
      %cst_19 = arith.constant dense<0.000000e+00> : vector<1x32xf32>
      %21 = tpu.matmul %19, %20, %cst_19 {dimension_numbers = #tpu.dot_dimension_numbers<[1], [0], [0], [1], [0, 0, 1, 1], [], []>} : vector<1x8xf32>, vector<8x32xf32>, vector<1x32xf32> -> vector<1x32xf32>
      %c0_20 = arith.constant 0 : index
      %c0_21 = arith.constant 0 : index
      %22 = vector.load %arg6[%c0_20, %c0_21] : memref<1x32xf32, #tpu.memory_space<vmem>>, vector<1x32xf32>
      %23 = arith.addf %21, %22 : vector<1x32xf32>
      %24 = arith.negf %23 : vector<1x32xf32>
      %25 = math.exp %24 : vector<1x32xf32>
      %cst_22 = arith.constant 1.000000e+00 : f32
      %26 = vector.broadcast %cst_22 : f32 to vector<1x32xf32>
      %27 = arith.addf %26, %25 : vector<1x32xf32>
      %28 = arith.divf %26, %27 : vector<1x32xf32>
      %29 = vector.shape_cast %28 : vector<1x32xf32> to vector<1x32x1xf32>
      %c0_23 = arith.constant 0 : index
      %c0_24 = arith.constant 0 : index
      %c0_25 = arith.constant 0 : index
      %30 = vector.load %arg7[%c0_23, %c0_24, %c0_25] : memref<1x32x1xf32, #tpu.memory_space<vmem>>, vector<1x32x1xf32>
      tpu.vector_store %arg7[%c0_23, %c0_24, %c0_25], %29 {strides = array<i32>} : memref<1x32x1xf32, #tpu.memory_space<vmem>>, vector<1x32x1xf32>,
    } else {
    }
    return
  }
  func.func @transform_0(%arg0: i32, %arg1: i32) -> (i32, i32, i32) {
    %c0_i32 = arith.constant 0 : i32
    %c0_i32_0 = arith.constant 0 : i32
    return %arg0, %c0_i32, %arg1 : i32, i32, i32
  }
  func.func @transform_1(%arg0: i32, %arg1: i32) -> (i32, i32) {
    %c0_i32 = arith.constant 0 : i32
    %c0_i32_0 = arith.constant 0 : i32
    %c0_i32_1 = arith.constant 0 : i32
    return %c0_i32, %c0_i32_0 : i32, i32
  }
  func.func @transform_2(%arg0: i32, %arg1: i32) -> (i32, i32) {
    %c0_i32 = arith.constant 0 : i32
    %c0_i32_0 = arith.constant 0 : i32
    %c0_i32_1 = arith.constant 0 : i32
    return %c0_i32, %c0_i32_0 : i32, i32
  }
  func.func @transform_3(%arg0: i32, %arg1: i32) -> (i32, i32) {
    %c0_i32 = arith.constant 0 : i32
    %c0_i32_0 = arith.constant 0 : i32
    %c0_i32_1 = arith.constant 0 : i32
    return %c0_i32, %c0_i32_0 : i32, i32
  }
  func.func @transform_4(%arg0: i32, %arg1: i32) -> (i32, i32) {
    %c0_i32 = arith.constant 0 : i32
    %c0_i32_0 = arith.constant 0 : i32
    %c0_i32_1 = arith.constant 0 : i32
    return %c0_i32, %c0_i32_0 : i32, i32
  }
  func.func @transform_5(%arg0: i32, %arg1: i32) -> (i32, i32, i32) {
    %c0_i32 = arith.constant 0 : i32
    %c0_i32_0 = arith.constant 0 : i32
    %c0_i32_1 = arith.constant 0 : i32
    return %arg0, %c0_i32, %c0_i32_0 : i32, i32, i32
  }
}

</mosaic_0001>

<bundles_post_ra>
// kernel: tpu_custom_call.1
= control target key start
LH: loop header
LB: loop body
LE: loop exit
PB: predicated region body
PF: predicated region fallthrough
CT: control target
= control target key end

     0   :  { %10 = vsyncpa [#allocation4], 0  ;;  %s967_s0 = inlined_call_operand.hbm [shape: f32[2,32,256], index: 0, kind: input, shape index: {}]   ;;  %s968_s1 = inlined_call_operand.vmem [shape: f32[32,8], index: 1, kind: input, shape index: {}]   ;;  %s969_s2 = inlined_call_operand.vmem [shape: f32[1,8], index: 2, kind: input, shape index: {}]   ;;  %s970_s3 = inlined_call_operand.vmem [shape: f32[8,32], index: 3, kind: input, shape index: {}]   ;;  %s971_s4 = inlined_call_operand.vmem [shape: f32[1,32], index: 4, kind: input, shape index: {}]   ;;  %s972_s5 = inlined_call_operand.vmem [shape: f32[2,32,1], index: 5, kind: output, shape index: {}]  }
   0x1   :  { %12 = vsyncpa [#allocation4 + $0x1], 0  ;;  %s850_s18 = smov 0   ;;  %s852_s19 = smov 0  }
   0x2   :  { %s854_s20 = smov 0   ;;  %s856_s21 = smov 0  }
   0x3   :  { %s858_s22 = smov 0   ;;  %s860_s23 = smov 0  }
   0x4 LB: > { %s631_s24 = sadd.s32 4294967295, %s813_s23   ;;  %s30_s25 = sadd.s32 1, %s809_s22  ;;  %s813_s23 = sphi %s860_s23, %s18_s23   ;;  %s809_s22 = sphi %s858_s22, %s980_s22   ;;  %s805_s21 = sphi %s856_s21, %s979_s21   ;;  %s801_s20 = sphi %s854_s20, %s978_s20   ;;  %s797_s19 = sphi %s852_s19, %s977_s19   ;;  %s793_s18 = sphi %s850_s18, %s976_s18  }
   0x5   : > { %p32_p0 = scmp.ge.s32.totalorder %s30_s25, 2  ;;  %s39_s26 = sadd.s32 1, %s801_s20 }
   0x6   : > { %p46_p1 = scmp.ne.s32.totalorder %s801_s20, %s797_s19  ;;  %p47_p2 = scmp.eq.s32.totalorder %s813_s23, 0 }
   0x7   : > { %s982_s25 = smov (%p32_p0, %s30_s25), 0  ;;  %p52_p4 = scmp.ne.s32.totalorder %s797_s19, %s793_s18 }
   0x8   : > { %p886_p3 = por %p47_p2, %p46_p1  ;;  %s34_s28 = ssub.s32 %s809_s22, %s982_s25 }
   0x9   : > { %p53_p5 = scmp.eq.s32.totalorder %s631_s24, 0  ;;  %p37_p6 = scmp.eq.s32.totalorder %s34_s28, 0 }
   0xa   : > { %p678_p8 = scmp.lt.s32.totalorder %s813_s23, 2  ;;  %s198_s6 = sand.u32 1, %s801_s20  }
   0xb   : > { %p893_p7 = por %p53_p5, %p52_p4  ;;  %s647_s7 = sshll.u32 %s809_s22, 10 }
   0xc   : > { %s899_s30 = scalar_select %p37_p6, %s801_s20, %s39_s26  }
   0xd   : > { %s635_s8 = sshll.u32 %s198_s6, 6  ;;  %s210_s11 = scalar_lea.hbm %s967_s0, %s647_s7 }
   0xe   : > { %s202_s12 = scalar_lea.vmem [#allocation3], %s635_s8  ;;  %p908_p9 = pnand %p678_p8, %p886_p3 }
   0xf   : > { %s211_s13 = sshll.u32 %s202_s12, 4  ;;  %s199_s15 = scalar_lea.sflag [#allocation4], %s198_s6  ;;  %s212_s13 = int_to_ptr.vmem [resolvable:$true] %s211_s13 }
  0x10   : > { %p737_p10 = pneg %p908_p9  ;;  %s748_s16 = scalar_lea.vmem %s212_s13, 1024 }
  0x11   : > { %p749_p11 = scmp.ne.s32.totalorder %s212_s13, %s748_s16  ;;  %s815_s17 = smov [#allocation3]  }
  0x12   : > { %s753_s18 = sshll.u32 %s815_s17, 4  ;;  %s754_s18 = int_to_ptr.vmem [resolvable:$false] %s753_s18 }
  0x13   : > { %p751_p12 = pnand %p749_p11, %p737_p10  ;;  %s755_s24 = scalar_lea.vmem %s754_s18, 2048 }
  0x14   : > { %p756_p0 = scmp.lt.s32.totalorder %s212_s13, %s754_s18  ;;  %p757_p1 = scmp.lt.s32.totalorder %s755_s24, %s748_s16 }
  0x15   : > { %p752_p13 = pneg %p751_p12 }
  0x16   : > { %p758_p2 = por %p757_p1, %p756_p0 }
  0x18   : > { %p759_p3 = pnand %p758_p2, %p752_p13 }
  0x1a   : > { %762 = shalt.err (!%p759_p3)
}
  0x1b   : > { %s816_s26 = smov 256   ;;  %s817_s27 = smov 16  }
  0x1c   : > { %677 = dma.hbm_to_vmem [thread:$0]  (!%p908_p9), %s210_s11, 1024, %s212_s13, %s199_s15, %s816_s26, %s816_s26, %s817_s27  }
  0x1d   : > { %p638_p4 = scmp.ge.s32.totalorder %s813_s23, 1  ;;  %p219_p5 = scmp.lt.s32.totalorder %s813_s23, 3 }
  0x1f   : > { %p220_p6 = pnand %p638_p4, %p219_p5 }
  0x20   : > { %s225_s28 = sand.u32 (!%p220_p6), 1, %s797_s19  }
  0x21   : > { %223 = sbr.rel (%p220_p6) target bundleno = 741 (0x2e5), region = 40  ;;  %s639_s6 = sshll.u32 (!%p220_p6), %s225_s28, 6 }
  0x22   : > { %s226_s7 = scalar_lea.sflag (!%p220_p6), [#allocation4], %s225_s28  ;;  %s229_s8 = scalar_lea.vmem (!%p220_p6), [#allocation3], %s639_s6 }
  0x26   : > { %788 = dma.done.wait (%p893_p7), %s226_s7, 1024  }
  0x27   : > { %790 = vsyncadd (%p893_p7), %s226_s7, 4294966272  ;;  %v262_v0 = vld [vmem:[%s229_s8] sm:$0xff]  ;;  %v263_v1 = vld [vmem:[%s229_s8 + $0x8] sm:$0xff]  ;;  %v818_v12 = vmov 0.0   ;;  %vm819_vm0 = vmmov 0   ;;  %v346_v17 = vlaneseq  ;;  %vm357_vm1 = vcmask 130112  }
  0x28   : > { %v266_v2 = vld [vmem:[%s229_s8 + $0x20] sm:$0xff]  ;;  %v321_v3 = vadd.f32 %v263_v1, %v262_v0  ;;  %v267_v4 = vld [vmem:[%s229_s8 + $0x28] sm:$0xff]  ;;  %v264_v5 = vld [vmem:[%s229_s8 + $0x10] sm:$0xff]  ;;  %656 = vmatprep.subr.mxu0 %v818_v12  ;;  %667 = vmatprep.subr.mxu1 %v818_v12  ;;  %vm364_vm2 = vcmask 195712   ;;  %vm371_vm3 = vcmask 261312   ;;  %vm373_vm4 = vcmask 261120  }
  0x29   : > { %v265_v6 = vld [vmem:[%s229_s8 + $0x18] sm:$0xff]  ;;  %v327_v7 = vadd.f32 %v267_v4, %v266_v2  ;;  %v268_v8 = vld [vmem:[%s229_s8 + $0x30] sm:$0xff]  ;;  %v338_v15 = vld [vmem:[%s968_s1 + $0x8] sm:$0xff]  ;;  %664 = vmatprep.mubr.msk.f32.mxu0 %vm819_vm0, %v818_v12  ;;  %669 = vmatprep.mubr.msk.f32.mxu1 %vm819_vm0, %v818_v12  ;;  %v347_v18 = vand.u32 127, %v346_v17  ;;  %v349_v19 = vshrl.u32 %v346_v17, 7  ;;  %vm449_vm5 = vcmask 64512  }
  0x2a   : > { %v269_v9 = vld [vmem:[%s229_s8 + $0x38] sm:$0xff]  ;;  %322 = vadd.xlane.f32.xlu0 %v321_v3  ;;  %v324_v10 = vadd.f32 %v265_v6, %v264_v5  ;;  %v339_v14 = vld [vmem:[%s968_s1 + $0x10] sm:$0xff]  ;;  %v337_v16 = vld [vmem:[%s968_s1] sm:$0xff]  ;;  %p257_p7 = scmp.lt.s32.totalorder %s805_s21, 1  ;;  %vm548_vm6 = vcmask 7168  }
  0x2b   : > { %328 = vadd.xlane.f32.xlu1 %v327_v7  ;;  %v330_v11 = vadd.f32 %v269_v9, %v268_v8  ;;  %v340_v13 = vld [vmem:[%s968_s1 + $0x18] sm:$0xff]  ;;  %v352_v20 = vadd.s32 4294967288, %v347_v18  ;;  %v359_v22 = vadd.s32 4294967280, %v347_v18  ;;  %v366_v23 = vadd.s32 4294967272, %v347_v18  ;;  %v447_v42 = vld [vmem:[%s970_s3] sm:$0xff] }
  0x2c   : > { %657 = vmatpush3.msra.mxu0 %v340_v13  ;;  %v350_v25 = vsub.s32 %v347_v18, %v349_v19  ;;  %668 = vmatpush3.msra.mxu1 %v447_v42  ;;  %v341_v43 = vld [vmem:[%s969_s2] sm:$0x1]  ;;  %v531_v55 = vsub.s32 0, %v349_v19  ;;  %s984_s21 = smov (!%p257_p7, %s805_s21), 1 }
  0x2d   : > { %658 = vmatprep.subr.mxu0 %v818_v12  ;;  %v355_v27 = vsub.s32 %v352_v20, %v349_v19  ;;  %v362_v28 = vsub.s32 %v359_v22, %v349_v19  ;;  %v369_v31 = vsub.s32 %v366_v23, %v349_v19  ;;  %v448_v48 = vld [vmem:[%s971_s4] sm:$0x1]  ;;  %s648_s28 = sshll.u32 %s984_s21, 5 }
  0x2e   : > { %325 = vadd.xlane.f32.xlu0 %v324_v10  ;;  %659 = vmatpush3.msra.mxu0 %v339_v14  ;;  %s261_s8 = scalar_lea.vmem %s972_s5, %s648_s28 }
  0x2f   : > { %331 = vadd.xlane.f32.xlu1 %v330_v11  ;;  %660 = vmatprep.subr.mxu0 %v818_v12 }
  0x30   : > { %661 = vmatpush3.msra.mxu0 %v338_v15 }
  0x31   : > { %662 = vmatprep.subr.mxu0 %v818_v12 }
  0x32   : > { %663 = vmatpush3.msra.mxu0 %v337_v16 }
  0xb3   : > { %v323_v21 = vpop.xlane.xlu0 %322 }
  0xb4   : > { %v329_v24 = vpop.xlane.xlu1 %328  ;;  %v333_v26 = vmul.f32 0.00390625, %v323_v21 }
  0xb5   : > { %v335_v29 = vmul.f32 0.00390625, %v329_v24 }
  0xb6   : > { %v351_v35 = vrot.slane %v333_v26, %v350_v25 }
  0xb7   : > { %v326_v30 = vpop.xlane.xlu0 %325  ;;  %v363_v37 = vrot.slane %v335_v29, %v362_v28 }
  0xb8   : > { %v334_v32 = vmul.f32 0.00390625, %v326_v30  ;;  %v332_v33 = vpop.xlane.xlu1 %331 }
  0xb9   : > { %v336_v34 = vmul.f32 0.00390625, %v332_v33 }
  0xba   : > { %v356_v36 = vrot.slane %v334_v32, %v355_v27 }
  0xbb   : > { %v370_v38 = vrot.slane %v336_v34, %v369_v31 }
  0xbc   : > { %v358_v39 = vsel %vm357_vm1, %v356_v36, %v351_v35 }
  0xbd   : > { %v365_v40 = vsel %vm364_vm2, %v363_v37, %v358_v39 }
  0xbe   : > { %v372_v41 = vsel %vm371_vm3, %v370_v38, %v365_v40 }
  0xbf   : > { %665 = vmatmul.mubr.msk.f32.vlgmr.msra.gmra.mxu0 %vm373_vm4, %v372_v41 }
 0x17f   : > { %v442_v44 = vpop.f32.mrf.mxu0 }
 0x180   : > { %v443_v45 = vadd.f32 %v442_v44, %v341_v43 }
 0x181   : > { %v666_v46 = vpop.f32.mrf.mxu0 }
 0x182   : > { %v446_v47 = vmax.f32 %v443_v45, 0.0 }
 0x184   : > { %670 = vmatmul.mubr.msk.f32.vlgmr.msra.gmra.mxu1 %vm449_vm5, %v446_v47 }
 0x244   : > { %v519_v49 = vpop.f32.mrf.mxu1 }
 0x245   : > { %v520_v50 = vadd.f32 %v519_v49, %v448_v48 }
 0x246   : > { %v671_v51 = vpop.f32.mrf.mxu1 }
 0x247   : > { %v644_v52 = vmul.f32 -1.442695, %v520_v50 }
 0x249   : > { %731 = vpow2.f32 %v644_v52 }
 0x256   : > { %v732_v53 = vpop.eup %731 }
 0x257   : > { %v526_v54 = vadd.f32 1.0, %v732_v53 }
 0x259   : > { %733 = vrcp.f32 %v526_v54 }
 0x266   : > { %v734_v56 = vpop.eup %733 }
 0x267   : > { %v532_v57 = vrot.slane %v734_v56, %v531_v55 }
 0x269   : > { %538 = vbcast.lane.b32.xlu1 %v532_v57, 264  ;;  %534 = vbcast.lane.b32.xlu0 %v532_v57, 256 }
 0x26d   : > { %542 = vbcast.lane.b32.xlu1 %v532_v57, 272 }
 0x271   : > { %546 = vbcast.lane.b32.xlu1 %v532_v57, 280 }
 0x2db   : > { %v539_v58 = vpop.permute.xlu1 %538  ;;  %v535_v59 = vpop.permute.xlu0 %534 }
 0x2dc   : > { %550 = vst.msk [vmem:[%s261_s8 + $0x8] sm:$0xff] %vm548_vm6, %v539_v58  ;;  %549 = vst.msk [vmem:[%s261_s8] sm:$0xff] %vm548_vm6, %v535_v59 }
 0x2df   : > { %v543_v60 = vpop.permute.xlu1 %542 }
 0x2e0   : > { %551 = vst.msk [vmem:[%s261_s8 + $0x10] sm:$0xff] %vm548_vm6, %v543_v60 }
 0x2e3   : > { %v547_v61 = vpop.permute.xlu1 %546 }
 0x2e4   : > { %552 = vst.msk [vmem:[%s261_s8 + $0x18] sm:$0xff] %vm548_vm6, %v547_v61 }
 0x2e5 PF: > { %s18_s23 = sadd.s32 1, %s813_s23   ;;  %s976_s18 = smov %s797_s19 }
 0x2e6   : > { %p15_p8 = scmp.ge.s32.totalorder %s18_s23, 4   ;;  %s977_s19 = smov %s801_s20 }
 0x2e7   : > { %s978_s20 = smov %s899_s30  ;;  %s979_s21 = smov %s809_s22 }
 0x2e8   : > { %s980_s22 = smov %s982_s25  ;;  %17 = sbr.rel (!%p15_p8) target bundleno = 4 (0x4), region = 92 }
 0x2ed   :  { %574 = vsyncpa [#allocation4], 1 }
 0x2ee   :  { %576 = vsyncpa [#allocation4 + $0x1], 1 }

</bundles_post_ra>
